<compile_context>
chip_gen: v6e
topology: v6e:2x2x1
jax: 0.10.0
libtpu: 0.0.40
codegen_flags: <defaults>
</compile_context>

<pallas_src>
import functools

import jax
import jax.numpy as jnp
from jax import lax
from jax.experimental import pallas as pl
from jax.experimental.pallas import tpu as pltpu

_OUT_SUBLANES = 8  # per-core-split output row padded to a full (8,128) f32 tile


def _round_up(a, b):
    return (a + b - 1) // b * b


def _num_core_splits():
    """2 grid splits only on v7x (2 TensorCores/chip); 1 elsewhere."""
    try:
        kind = (jax.devices()[0].device_kind or "").lower()
    except Exception:
        return 1
    return 2 if "v7" in kind else 1


def _focal_body(x, z, *, gamma, hard_targets):
    """focal = (1 - exp(-bce))**gamma * bce with stable BCE-with-logits."""
    if hard_targets:
        # Hard {0,1} targets: 2 heavy EUP ops (exp, log1p) + an exact reciprocal
        # instead of 3 (exp, log1p, exp). Algebraically equal to exp(-bce):
        #   pt = sigmoid((2z-1)*x), built from e = exp(-|x|) in (0,1] (no
        #   overflow/underflow issues for any finite logits).
        e = jnp.exp(-jnp.abs(x))
        r = pl.reciprocal(1.0 + e)                     # exact; denom in [1,2]
        bce = jnp.maximum(x, 0.0) - x * z + jnp.log1p(e)
        sign_ok = (2.0 * z - 1.0) * x >= 0.0
        pt = jnp.where(sign_ok, r, e * r)
    else:
        # General (possibly soft) targets — matches the PyTorch formula exactly.
        bce = jnp.maximum(x, 0.0) - x * z + jnp.log1p(jnp.exp(-jnp.abs(x)))
        pt = jnp.exp(-bce)

    one_m_pt = 1.0 - pt
    g = float(gamma)
    if g.is_integer() and 0 <= g <= 8:
        # Unroll integer gamma into VPU multiplies (avoids exp+log on EUP).
        gi = int(g)
        w = jnp.ones_like(one_m_pt) if gi == 0 else one_m_pt
        for _ in range(gi - 1):
            w = w * one_m_pt
    else:
        w = jnp.power(one_m_pt, g)
    return w * bce


def _focal_loss_kernel(x_ref, z_ref, out_ref, acc_ref, *,
                       gamma, hard_targets, inv_n, valid_rows,
                       block_rows, lane_width, blocks_per_split, needs_mask):
    c = pl.program_id(0)            # core-split axis ("parallel")
    i = pl.program_id(1)            # reduction axis ("arbitrary")
    nb = pl.num_programs(1)

    @pl.when(i == 0)
    def _():
        acc_ref[...] = jnp.zeros_like(acc_ref)

    x = x_ref[...].astype(jnp.float32)
    z = z_ref[...].astype(jnp.float32)
    focal = _focal_body(x, z, gamma=gamma, hard_targets=hard_targets)

    n_slabs = block_rows // _OUT_SUBLANES

    def accum(vals):
        # Fold the block's rows into an (8, lane) accumulator: same number of
        # VALU adds as a full-block accumulator, far fewer acc loads/stores.
        acc_ref[...] += vals.reshape(n_slabs, _OUT_SUBLANES, lane_width).sum(axis=0)

    if needs_mask:
        # Only the block(s) straddling/beyond the last valid row pay for the
        # mask; all full blocks take the unmasked path.
        block_row0 = (c * blocks_per_split + i) * block_rows   # unclamped
        is_full = block_row0 + block_rows <= valid_rows

        @pl.when(is_full)
        def _():
            accum(focal)

        @pl.when(jnp.logical_not(is_full))
        def _():
            rid = lax.broadcasted_iota(jnp.int32, (block_rows, lane_width), 0)
            accum(jnp.where(rid + block_row0 < valid_rows, focal, 0.0))
    else:
        accum(focal)

    @pl.when(i == nb - 1)
    def _():
        # Cross-lane/sublane reduce + mean scale once per core split.
        total = jnp.sum(acc_ref[...]) * jnp.float32(inv_n)
        out_ref[...] = jnp.broadcast_to(total, (_OUT_SUBLANES, 128)).astype(jnp.float32)


def focal_loss(logits, targets, *, gamma=2, hard_targets=False,
               max_lane_width=1024, target_block_elems=1 << 20):
    """Pallas implementation of FocalLoss(gamma, alpha=None, reduction='mean')."""
    assert logits.shape == targets.shape
    n = int(logits.size)
    assert n > 0

    x = logits.reshape(-1)
    z = targets.reshape(-1)

    # Prefer a lane width that divides N exactly: the 2-D view is then a
    # metadata-only reshape and the kernel reads the original HBM buffer
    # directly (no pad round trip).
    lane_width = None
    w = max_lane_width
    while w >= 128:
        if n % w == 0:
            lane_width = w
            break
        w //= 2

    if lane_width is None:
        # Ragged N: pad with benign values (logits=+30, targets=1). Their focal
        # contribution is exactly 0 in f32, so no in-kernel mask is needed for
        # pad elements and the mean (divided by the true N) is unchanged.
        lane_width = max_lane_width if n >= max_lane_width else 128
        padded_n = _round_up(n, lane_width)
        x = jnp.pad(x, (0, padded_n - n), constant_values=30.0)
        z = jnp.pad(z, (0, padded_n - n), constant_values=1.0)
    else:
        padded_n = n

    rows = padded_n // lane_width
    x = x.reshape(rows, lane_width)
    z = z.reshape(rows, lane_width)

    # ~4 MiB f32 input blocks (1M elements), capped for small inputs.
    block_rows = min(max(target_block_elems // lane_width, _OUT_SUBLANES),
                     _round_up(rows, _OUT_SUBLANES))
    block_rows = _round_up(block_rows, _OUT_SUBLANES)
    nb_total = pl.cdiv(rows, block_rows)

    num_splits = _num_core_splits() if nb_total >= 2 else 1
    blocks_per_split = pl.cdiv(nb_total, num_splits)
    # Mask is needed only if the last block is row-partial or the split grid
    # over-covers the block count (duplicate blocks are fully masked).
    needs_mask = (rows % block_rows != 0) or (num_splits * blocks_per_split != nb_total)

    kernel = functools.partial(
        _focal_loss_kernel,
        gamma=gamma,
        hard_targets=hard_targets,
        inv_n=1.0 / float(n),
        valid_rows=rows,
        block_rows=block_rows,
        lane_width=lane_width,
        blocks_per_split=blocks_per_split,
        needs_mask=needs_mask,
    )

    def in_map(c, i, bps=blocks_per_split, last=nb_total - 1):
        # Clamp so over-covering grid steps re-read an in-bounds block (their
        # contribution is zeroed by the row mask in the kernel).
        return (jnp.minimum(c * bps + i, last), 0)

    in_spec = pl.BlockSpec((block_rows, lane_width), in_map)

    partials = pl.pallas_call(
        kernel,
        out_shape=jax.ShapeDtypeStruct(
            (num_splits * _OUT_SUBLANES, 128), jnp.float32),
        grid_spec=pltpu.PrefetchScalarGridSpec(
            num_scalar_prefetch=0,
            grid=(num_splits, blocks_per_split),
            in_specs=[in_spec, in_spec],
            out_specs=pl.BlockSpec((_OUT_SUBLANES, 128), lambda c, i: (c, 0)),
            scratch_shapes=[pltpu.VMEM((_OUT_SUBLANES, lane_width), jnp.float32)],
        ),
        compiler_params=pltpu.CompilerParams(
            dimension_semantics=("parallel", "arbitrary"),
            vmem_limit_bytes=48 * 1024 * 1024,   # < 64 MiB/TC on v7x, < 128 elsewhere
        ),
    )(x, z)

    # Each core split's row already carries partial_sum * (1/N).
    return jnp.sum(partials[::_OUT_SUBLANES, 0])


def focal_loss_ref(logits, targets, gamma=2.0):
    """Pure-JAX reference mirroring the PyTorch forward exactly."""
    x = logits.astype(jnp.float32)
    z = targets.astype(jnp.float32)
    bce = jnp.maximum(x, 0.0) - x * z + jnp.log1p(jnp.exp(-jnp.abs(x)))
    pt = jnp.exp(-bce)
    focal = (1.0 - pt) ** gamma * bce
    return jnp.mean(focal)


if __name__ == "__main__":
    key = jax.random.PRNGKey(0)
    k1, k2, k3, k4 = jax.random.split(key, 4)

    # (1) Default use case: 2-D (batch, classes) multi-label logits, f32.
    #     N = 2048 is a multiple of the lane width -> no-pad, no-copy path.
    batch, classes = 16, 128
    logits = jax.random.normal(k1, (batch, classes), dtype=jnp.float32)
    targets = (jax.random.uniform(k2, (batch, classes)) > 0.5).astype(jnp.float32)

    loss = jax.block_until_ready(focal_loss(logits, targets, gamma=2))
    ref = focal_loss_ref(logits, targets, gamma=2.0)
    assert jnp.allclose(loss, ref, rtol=1e-5, atol=1e-6), (loss, ref)

    # (2) Ragged shape (benign-pad path, last-block row mask) + bf16 inputs.
    b2, c2 = 7, 100
    logits2 = jax.random.normal(k3, (b2, c2), dtype=jnp.bfloat16)
    targets2 = (jax.random.uniform(k4, (b2, c2)) > 0.5).astype(jnp.bfloat16)
    loss2 = jax.block_until_ready(focal_loss(logits2, targets2, gamma=2))
    ref2 = focal_loss_ref(logits2, targets2, gamma=2.0)
    assert jnp.allclose(loss2, ref2, rtol=1e-5, atol=1e-6), (loss2, ref2)

    # (3) Opt-in reduced-transcendental path for hard {0,1} targets.
    loss3 = jax.block_until_ready(
        focal_loss(logits, targets, gamma=2, hard_targets=True))
    assert jnp.allclose(loss3, ref, rtol=1e-4, atol=1e-6), (loss3, ref)

    print("KERNEL_OK")
</pallas_src>

<mosaic_0001>
module attributes {stable_mosaic.version = 11 : i64} {
  func.func @_focal_loss_kernel(%arg0: i32, %arg1: i32, %arg2: memref<8x1024xf32, #tpu.memory_space<vmem>>, %arg3: memref<8x1024xf32, #tpu.memory_space<vmem>>, %arg4: memref<8x128xf32, #tpu.memory_space<vmem>>, %arg5: memref<8x1024xf32, #tpu.memory_space<vmem>>) attributes {dimension_semantics = [#tpu.dimension_semantics<parallel>, #tpu.dimension_semantics<arbitrary>], iteration_bounds = array<i64: 1, 1>, scalar_prefetch = 0 : i64, scratch_operands = 1 : i64, tpu.core_type = #tpu.core_type<tc>, window_params = [{transform_indices = @transform_0, window_bounds = array<i64: 8, 1024>}, {transform_indices = @transform_1, window_bounds = array<i64: 8, 1024>}, {transform_indices = @transform_2, window_bounds = array<i64: 8, 128>}]} {
    %c0_i32 = arith.constant 0 : i32
    %0 = arith.cmpi eq, %arg1, %c0_i32 : i32
    %1 = arith.extui %0 : i1 to i32
    %c0_i32_0 = arith.constant 0 : i32
    %2 = arith.cmpi ne, %1, %c0_i32_0 : i32
    scf.if %2 {
      %cst_12 = arith.constant 0.000000e+00 : f32
      %35 = vector.broadcast %cst_12 : f32 to vector<8x1024xf32>
      %c0_13 = arith.constant 0 : index
      %c0_14 = arith.constant 0 : index
      %36 = vector.load %arg5[%c0_13, %c0_14] : memref<8x1024xf32, #tpu.memory_space<vmem>>, vector<8x1024xf32>
      tpu.vector_store %arg5[%c0_13, %c0_14], %35 {strides = array<i32>} : memref<8x1024xf32, #tpu.memory_space<vmem>>, vector<8x1024xf32>,
    } else {
    }
    %c0 = arith.constant 0 : index
    %c0_1 = arith.constant 0 : index
    %3 = vector.load %arg2[%c0, %c0_1] : memref<8x1024xf32, #tpu.memory_space<vmem>>, vector<8x1024xf32>
    %c0_2 = arith.constant 0 : index
    %c0_3 = arith.constant 0 : index
    %4 = vector.load %arg3[%c0_2, %c0_3] : memref<8x1024xf32, #tpu.memory_space<vmem>>, vector<8x1024xf32>
    %cst = arith.constant 0.000000e+00 : f32
    %5 = vector.broadcast %cst : f32 to vector<8x1024xf32>
    %6 = arith.maximumf %3, %5 : vector<8x1024xf32>
    %7 = arith.mulf %3, %4 : vector<8x1024xf32>
    %8 = arith.subf %6, %7 : vector<8x1024xf32>
    %9 = math.absf %3 : vector<8x1024xf32>
    %cst_4 = arith.constant 0.000000e+00 : f32
    %10 = vector.broadcast %cst_4 : f32 to vector<8x1024xf32>
    %11 = arith.subf %10, %9 : vector<8x1024xf32>
    %12 = math.exp %11 : vector<8x1024xf32>
    %13 = math.log1p %12 : vector<8x1024xf32>
    %14 = arith.addf %8, %13 : vector<8x1024xf32>
    %cst_5 = arith.constant 0.000000e+00 : f32
    %15 = vector.broadcast %cst_5 : f32 to vector<8x1024xf32>
    %16 = arith.subf %15, %14 : vector<8x1024xf32>
    %17 = math.exp %16 : vector<8x1024xf32>
    %cst_6 = arith.constant 1.000000e+00 : f32
    %18 = vector.broadcast %cst_6 : f32 to vector<8x1024xf32>
    %19 = arith.subf %18, %17 : vector<8x1024xf32>
    %20 = arith.mulf %19, %19 : vector<8x1024xf32>
    %21 = arith.mulf %20, %14 : vector<8x1024xf32>
    %c1_i32 = arith.constant 1 : i32
    %22 = arith.muli %arg0, %c1_i32 : i32
    %23 = arith.addi %22, %arg1 : i32
    %c8_i32 = arith.constant 8 : i32
    %24 = arith.muli %23, %c8_i32 : i32
    %c8_i32_7 = arith.constant 8 : i32
    %25 = arith.addi %24, %c8_i32_7 : i32
    %c2_i32 = arith.constant 2 : i32
    %26 = arith.cmpi sle, %25, %c2_i32 : i32
    %27 = arith.extui %26 : i1 to i32
    %c0_i32_8 = arith.constant 0 : i32
    %28 = arith.cmpi ne, %27, %c0_i32_8 : i32
    scf.if %28 {
      %c0_12 = arith.constant 0 : index
      %c0_13 = arith.constant 0 : index
      %35 = vector.load %arg5[%c0_12, %c0_13] : memref<8x1024xf32, #tpu.memory_space<vmem>>, vector<8x1024xf32>
      %36 = vector.shape_cast %21 : vector<8x1024xf32> to vector<1x8x1024xf32>
      %cst_14 = arith.constant dense<0.000000e+00> : vector<8x1024xf32>
      %37 = vector.multi_reduction <add>, %36, %cst_14 [0] : vector<1x8x1024xf32> to vector<8x1024xf32>
      %38 = arith.addf %35, %37 : vector<8x1024xf32>
      %c0_15 = arith.constant 0 : index
      %c0_16 = arith.constant 0 : index
      %39 = vector.load %arg5[%c0_15, %c0_16] : memref<8x1024xf32, #tpu.memory_space<vmem>>, vector<8x1024xf32>
      tpu.vector_store %arg5[%c0_15, %c0_16], %38 {strides = array<i32>} : memref<8x1024xf32, #tpu.memory_space<vmem>>, vector<8x1024xf32>,
    } else {
    }
    %true = arith.constant true
    %29 = arith.xori %26, %true : i1
    %30 = arith.extui %29 : i1 to i32
    %c0_i32_9 = arith.constant 0 : i32
    %31 = arith.cmpi ne, %30, %c0_i32_9 : i32
    scf.if %31 {
      %35 = tpu.iota {dimensions = array<i32: 0>} : vector<8x1024xi32>
      %36 = vector.broadcast %24 : i32 to vector<8x1024xi32>
      %37 = arith.addi %35, %36 : vector<8x1024xi32>
      %c2_i32_12 = arith.constant 2 : i32
      %38 = vector.broadcast %c2_i32_12 : i32 to vector<8x1024xi32>
      %39 = arith.cmpi slt, %37, %38 : vector<8x1024xi32>
      %cst_13 = arith.constant 0.000000e+00 : f32
      %40 = vector.broadcast %cst_13 : f32 to vector<8x1024xf32>
      %41 = arith.select %39, %21, %40 : vector<8x1024xi1>, vector<8x1024xf32>
      %c0_14 = arith.constant 0 : index
      %c0_15 = arith.constant 0 : index
      %42 = vector.load %arg5[%c0_14, %c0_15] : memref<8x1024xf32, #tpu.memory_space<vmem>>, vector<8x1024xf32>
      %43 = vector.shape_cast %41 : vector<8x1024xf32> to vector<1x8x1024xf32>
      %cst_16 = arith.constant dense<0.000000e+00> : vector<8x1024xf32>
      %44 = vector.multi_reduction <add>, %43, %cst_16 [0] : vector<1x8x1024xf32> to vector<8x1024xf32>
      %45 = arith.addf %42, %44 : vector<8x1024xf32>
      %c0_17 = arith.constant 0 : index
      %c0_18 = arith.constant 0 : index
      %46 = vector.load %arg5[%c0_17, %c0_18] : memref<8x1024xf32, #tpu.memory_space<vmem>>, vector<8x1024xf32>
      tpu.vector_store %arg5[%c0_17, %c0_18], %45 {strides = array<i32>} : memref<8x1024xf32, #tpu.memory_space<vmem>>, vector<8x1024xf32>,
    } else {
    }
    %c0_i32_10 = arith.constant 0 : i32
    %32 = arith.cmpi eq, %arg1, %c0_i32_10 : i32
    %33 = arith.extui %32 : i1 to i32
    %c0_i32_11 = arith.constant 0 : i32
    %34 = arith.cmpi ne, %33, %c0_i32_11 : i32
    scf.if %34 {
      %c0_12 = arith.constant 0 : index
      %c0_13 = arith.constant 0 : index
      %35 = vector.load %arg5[%c0_12, %c0_13] : memref<8x1024xf32, #tpu.memory_space<vmem>>, vector<8x1024xf32>
      %36 = vector.shape_cast %35 : vector<8x1024xf32> to vector<1x8x1024xf32>
      %cst_14 = arith.constant dense<0.000000e+00> : vector<1xf32>
      %37 = vector.multi_reduction <add>, %36, %cst_14 [1, 2] : vector<1x8x1024xf32> to vector<1xf32>
      %38 = vector.shape_cast %37 : vector<1xf32> to vector<1x1x1xf32>
      %39 = vector.extract %38[0, 0, 0] : f32 from vector<1x1x1xf32>
      %cst_15 = arith.constant 4.8828125E-4 : f32
      %40 = arith.mulf %39, %cst_15 : f32
      %41 = vector.broadcast %40 : f32 to vector<8x128xf32>
      %c0_16 = arith.constant 0 : index
      %c0_17 = arith.constant 0 : index
      %42 = vector.load %arg4[%c0_16, %c0_17] : memref<8x128xf32, #tpu.memory_space<vmem>>, vector<8x128xf32>
      tpu.vector_store %arg4[%c0_16, %c0_17], %41 {strides = array<i32>} : memref<8x128xf32, #tpu.memory_space<vmem>>, vector<8x128xf32>,
    } else {
    }
    return
  }
  func.func @transform_0(%arg0: i32, %arg1: i32) -> (i32, i32) {
    %c1_i32 = arith.constant 1 : i32
    %0 = arith.muli %arg0, %c1_i32 : i32
    %1 = arith.addi %0, %arg1 : i32
    %c0_i32 = arith.constant 0 : i32
    %2 = arith.minsi %1, %c0_i32 : i32
    %c0_i32_0 = arith.constant 0 : i32
    %c0_i32_1 = arith.constant 0 : i32
    return %2, %c0_i32_0 : i32, i32
  }
  func.func @transform_1(%arg0: i32, %arg1: i32) -> (i32, i32) {
    %c1_i32 = arith.constant 1 : i32
    %0 = arith.muli %arg0, %c1_i32 : i32
    %1 = arith.addi %0, %arg1 : i32
    %c0_i32 = arith.constant 0 : i32
    %2 = arith.minsi %1, %c0_i32 : i32
    %c0_i32_0 = arith.constant 0 : i32
    %c0_i32_1 = arith.constant 0 : i32
    return %2, %c0_i32_0 : i32, i32
  }
  func.func @transform_2(%arg0: i32, %arg1: i32) -> (i32, i32) {
    %c0_i32 = arith.constant 0 : i32
    %c0_i32_0 = arith.constant 0 : i32
    return %arg0, %c0_i32 : i32, i32
  }
}

</mosaic_0001>

<bundles_post_ra>
// kernel: tpu_custom_call.1
= control target key start
LH: loop header
LB: loop body
LE: loop exit
PB: predicated region body
PF: predicated region fallthrough
CT: control target
= control target key end

     0   :  { %7 = vsyncpa [#allocation4], 0  ;;  %s932_s0 = inlined_call_operand.hbm [shape: f32[2,1024], index: 0, kind: input, shape index: {}]   ;;  %s933_s1 = inlined_call_operand.hbm [shape: f32[2,1024], index: 1, kind: input, shape index: {}]   ;;  %s934_s2 = inlined_call_operand.hbm [shape: f32[8,128], index: 2, kind: output, shape index: {}]  }
   0x1   :  { %8 = vsyncpa [#allocation7], 0 }
   0x2   :  { %9 = vsyncpa [#allocation5], 0 }
   0x3   :  { %21 = vsyncadd [#allocation4], 768  ;;  %s726_s9 = smov [#allocation3]  }
   0x4   :  { %s27_s10 = sshll.u32 %s726_s9, 4  ;;  %s28_s10 = int_to_ptr.vmem [resolvable:$true] %s27_s10 }
   0x5   :  { %s668_s11 = scalar_lea.vmem %s28_s10, 256  ;;  %s672_s12 = scalar_lea.vmem %s28_s10, 1024 }
   0x6   :  { %p669_p0 = scmp.ne.s32.totalorder %s28_s10, %s668_s11  ;;  %p673_p1 = scmp.lt.s32.totalorder %s28_s10, %s28_s10 }
   0x7   :  { %p674_p2 = scmp.lt.s32.totalorder %s672_s12, %s668_s11 }
   0x9   :  { %p675_p3 = por %p674_p2, %p673_p1 }
   0xb   :  { %p676_p4 = pnand %p675_p3, %p669_p0 }
   0xd   :  { %679 = shalt.err (!%p676_p4)
}
   0xe   :  { %s727_s13 = smov 256   ;;  %s728_s14 = smov 16  }
   0xf   :  { %33 = dma.hbm_to_vmem [thread:$0]  %s932_s0, 256, %s28_s10, [#allocation4], %s727_s13, %s727_s13, %s728_s14  }
  0x10   :  { %45 = vsyncadd [#allocation7], 768  ;;  %s729_s17 = smov [#allocation6]  }
  0x11   :  { %s51_s18 = sshll.u32 %s729_s17, 4  ;;  %s52_s18 = int_to_ptr.vmem [resolvable:$true] %s51_s18 }
  0x12   :  { %s688_s19 = scalar_lea.vmem %s52_s18, 256  ;;  %s692_s20 = scalar_lea.vmem %s52_s18, 1024 }
  0x13   :  { %p689_p5 = scmp.ne.s32.totalorder %s52_s18, %s688_s19  ;;  %p693_p6 = scmp.lt.s32.totalorder %s52_s18, %s52_s18 }
  0x14   :  { %p694_p7 = scmp.lt.s32.totalorder %s692_s20, %s688_s19 }
  0x16   :  { %p695_p8 = por %p694_p7, %p693_p6 }
  0x18   :  { %p696_p9 = pnand %p695_p8, %p689_p5 }
  0x1a   :  { %699 = shalt.err (!%p696_p9)
}
  0x1b   :  { %57 = dma.hbm_to_vmem [thread:$0]  %s933_s1, 256, %s52_s18, [#allocation7], %s727_s13, %s727_s13, %s728_s14  }
  0x1c   :  { %720 = dma.done.wait [#allocation4], 1024  }
  0x1d   :  { %721 = vsyncadd [#allocation4], 4294966272 }
  0x1e   :  { %722 = dma.done.wait [#allocation7], 1024  }
  0x1f   :  { %723 = vsyncadd [#allocation7], 4294966272  ;;  %v753_v0 = vld [vmem:[#allocation3] sm:$0xff]  ;;  %v755_v1 = vld [vmem:[#allocation3 + $0x8] sm:$0xff]  ;;  %s731_s0 = smov [#allocation8]  }
  0x20   :  { %v757_v2 = vld [vmem:[#allocation3 + $0x10] sm:$0xff]  ;;  %v759_v3 = vld [vmem:[#allocation3 + $0x18] sm:$0xff]  ;;  %v761_v4 = vld [vmem:[#allocation3 + $0x20] sm:$0xff]  ;;  %v130_v7 = vand.u32 2147483647, %v753_v0  ;;  %v106_v38 = vmax.f32 %v753_v0, 0.0 }
  0x21   :  { %v763_v5 = vld [vmem:[#allocation3 + $0x28] sm:$0xff]  ;;  %v765_v6 = vld [vmem:[#allocation3 + $0x30] sm:$0xff]  ;;  %v768_v8 = vld [vmem:[#allocation3 + $0x38] sm:$0xff]  ;;  %v131_v9 = vand.u32 2147483647, %v755_v1  ;;  %v107_v39 = vmax.f32 %v755_v1, 0.0 }
  0x22   :  { %v132_v10 = vand.u32 2147483647, %v757_v2  ;;  %v133_v11 = vand.u32 2147483647, %v759_v3  ;;  %v134_v12 = vand.u32 2147483647, %v761_v4 }
  0x23   :  { %v135_v13 = vand.u32 2147483647, %v763_v5  ;;  %v136_v14 = vand.u32 2147483647, %v765_v6  ;;  %v138_v15 = vsub.f32 0.0, %v130_v7  ;;  %v139_v16 = vsub.f32 0.0, %v131_v9 }
  0x24   :  { %v140_v17 = vsub.f32 0.0, %v132_v10  ;;  %v141_v18 = vsub.f32 0.0, %v133_v11  ;;  %v137_v19 = vand.u32 2147483647, %v768_v8  ;;  %v142_v20 = vsub.f32 0.0, %v134_v12  ;;  %v98_v32 = vld [vmem:[#allocation6] sm:$0xff] }
  0x25   :  { %v143_v21 = vsub.f32 0.0, %v135_v13  ;;  %v146_v22 = vmul.f32 1.442695, %v138_v15  ;;  %v148_v23 = vmul.f32 1.442695, %v139_v16  ;;  %v144_v25 = vsub.f32 0.0, %v136_v14 }
  0x26   :  { %v150_v24 = vmul.f32 1.442695, %v140_v17  ;;  %v152_v26 = vmul.f32 1.442695, %v141_v18  ;;  %v154_v27 = vmul.f32 1.442695, %v142_v20  ;;  %v114_v45 = vmul.f32 %v98_v32, %v753_v0 }
  0x27   :  { %612 = vpow2.f32 %v146_v22  ;;  %v145_v28 = vsub.f32 0.0, %v137_v19  ;;  %v156_v29 = vmul.f32 1.442695, %v143_v21  ;;  %v158_v30 = vmul.f32 1.442695, %v144_v25  ;;  %v99_v35 = vld [vmem:[#allocation6 + $0x8] sm:$0xff] }
  0x28   :  { %614 = vpow2.f32 %v148_v23  ;;  %v100_v36 = vld [vmem:[#allocation6 + $0x10] sm:$0xff]  ;;  %v101_v37 = vld [vmem:[#allocation6 + $0x18] sm:$0xff]  ;;  %v102_v42 = vld [vmem:[#allocation6 + $0x20] sm:$0xff]  ;;  %v108_v43 = vmax.f32 %v757_v2, 0.0  ;;  %v109_v44 = vmax.f32 %v759_v3, 0.0  ;;  %v110_v50 = vmax.f32 %v761_v4, 0.0 }
  0x29   :  { %616 = vpow2.f32 %v150_v24  ;;  %v160_v31 = vmul.f32 1.442695, %v145_v28  ;;  %v103_v48 = vld [vmem:[#allocation6 + $0x28] sm:$0xff]  ;;  %v104_v49 = vld [vmem:[#allocation6 + $0x30] sm:$0xff]  ;;  %v111_v51 = vmax.f32 %v763_v5, 0.0  ;;  %v105_v54 = vld [vmem:[#allocation6 + $0x38] sm:$0xff]  ;;  %v115_v55 = vmul.f32 %v99_v35, %v755_v1 }
  0x2a   :  { %618 = vpow2.f32 %v152_v26  ;;  %v116_v56 = vmul.f32 %v100_v36, %v757_v2  ;;  %v117_v57 = vmul.f32 %v101_v37, %v759_v3  ;;  %v112_v58 = vmax.f32 %v765_v6, 0.0  ;;  %s590_s1 = sshll.u32 %s731_s0, 4  ;;  %s591_s1 = int_to_ptr.vmem [resolvable:$true] %s590_s1 }
  0x2b   :  { %620 = vpow2.f32 %v154_v27  ;;  %v118_v59 = vmul.f32 %v102_v42, %v761_v4  ;;  %v113_v62 = vmax.f32 %v768_v8, 0.0  ;;  %v119_v63 = vmul.f32 %v103_v48, %v763_v5  ;;  %s700_s25 = scalar_lea.vmem %s591_s1, 128  ;;  %p705_p11 = scmp.lt.s32.totalorder %s591_s1, %s591_s1 }
  0x2c   :  { %622 = vpow2.f32 %v156_v29  ;;  %v120_v0 = vmul.f32 %v104_v49, %v765_v6  ;;  %v122_v1 = vsub.f32 %v106_v38, %v114_v45  ;;  %v121_v3 = vmul.f32 %v105_v54, %v768_v8  ;;  %p701_p10 = scmp.ne.s32.totalorder %s591_s1, %s700_s25  ;;  %p706_p12 = scmp.lt.s32.totalorder %s700_s25, %s700_s25 }
  0x2d   :  { %624 = vpow2.f32 %v158_v30  ;;  %v123_v9 = vsub.f32 %v107_v39, %v115_v55  ;;  %v813_v10 = vsub.f32 %v108_v43, %v116_v56  ;;  %v815_v11 = vsub.f32 %v109_v44, %v117_v57 }
  0x2e   :  { %626 = vpow2.f32 %v160_v31  ;;  %v820_v6 = vsub.f32 %v110_v50, %v118_v59  ;;  %v824_v14 = vsub.f32 %v111_v51, %v119_v63  ;;  %v833_v24 = vsub.f32 %v112_v58, %v120_v0  ;;  %p707_p13 = por %p706_p12, %p705_p11 }
  0x2f   :  { %v835_v25 = vsub.f32 %v113_v62, %v121_v3  ;;  %v421_v45 = vlaneseq }
  0x30   :  { %p708_p0 = pnand %p707_p13, %p701_p10 }
  0x34   :  { %v777_v33 = vpop.eup %612 }
  0x35   :  { %v779_v34 = vpop.eup %614  ;;  %v162_v40 = vadd.f32 1.0, %v777_v33  ;;  %v165_v7 = vmul.f32 -0.5, %v777_v33  ;;  %v168_v15 = vand.u32 2147483647, %v777_v33 }
  0x36   :  { %v784_v41 = vpop.eup %616  ;;  %v171_v46 = vadd.f32 1.0, %v779_v34  ;;  %v174_v12 = vmul.f32 -0.5, %v779_v34  ;;  %v177_v19 = vand.u32 2147483647, %v779_v34 }
  0x37   :  { %v790_v47 = vpop.eup %618  ;;  %628 = vlog2.f32 %v162_v40  ;;  %v180_v52 = vadd.f32 1.0, %v784_v41  ;;  %v183_v13 = vmul.f32 -0.5, %v784_v41  ;;  %v166_v18 = vadd.f32 1.0, %v165_v7 }
  0x38   :  { %v795_v53 = vpop.eup %620  ;;  %630 = vlog2.f32 %v171_v46  ;;  %v189_v60 = vadd.f32 1.0, %v790_v47  ;;  %v192_v16 = vmul.f32 -0.5, %v790_v47  ;;  %v175_v21 = vadd.f32 1.0, %v174_v12 }
  0x39   :  { %632 = vlog2.f32 %v180_v52  ;;  %v803_v61 = vpop.eup %622  ;;  %v198_v4 = vadd.f32 1.0, %v795_v53  ;;  %v201_v20 = vmul.f32 -0.5, %v795_v53  ;;  %v186_v22 = vand.u32 2147483647, %v784_v41 }
  0x3a   :  { %v808_v2 = vpop.eup %624  ;;  %634 = vlog2.f32 %v189_v60  ;;  %v207_v8 = vadd.f32 1.0, %v803_v61  ;;  %v184_v26 = vadd.f32 1.0, %v183_v13  ;;  %v195_v27 = vand.u32 2147483647, %v790_v47 }
  0x3b   :  { %v818_v5 = vpop.eup %626  ;;  %636 = vlog2.f32 %v198_v4  ;;  %v216_v17 = vadd.f32 1.0, %v808_v2  ;;  %v193_v28 = vadd.f32 1.0, %v192_v16  ;;  %v204_v29 = vand.u32 2147483647, %v795_v53 }
  0x3c   :  { %638 = vlog2.f32 %v207_v8  ;;  %v225_v23 = vadd.f32 1.0, %v818_v5  ;;  %v210_v30 = vmul.f32 -0.5, %v803_v61  ;;  %v167_v31 = vmul.f32 %v777_v33, %v166_v18 }
  0x3d   :  { %640 = vlog2.f32 %v216_v17  ;;  %vm841_vm0 = vcmp.lt.f32.partialorder %v168_v15, 0.0004427343  ;;  %vm845_vm1 = vcmp.lt.f32.partialorder %v177_v19, 0.0004427343  ;;  %v202_v36 = vadd.f32 1.0, %v201_v20 }
  0x3e   :  { %642 = vlog2.f32 %v225_v23  ;;  %v176_v38 = vmul.f32 %v779_v34, %v175_v21  ;;  %vm850_vm2 = vcmp.lt.f32.partialorder %v186_v22, 0.0004427343  ;;  %v213_v40 = vand.u32 2147483647, %v803_v61 }
  0x3f   :  { %v219_v33 = vmul.f32 -0.5, %v808_v2  ;;  %v185_v44 = vmul.f32 %v784_v41, %v184_v26  ;;  %vm857_vm3 = vcmp.lt.f32.partialorder %v195_v27, 0.0004427343  ;;  %v228_v46 = vmul.f32 -0.5, %v818_v5 }
  0x40   :  { %v194_v49 = vmul.f32 %v790_v47, %v193_v28  ;;  %vm863_vm4 = vcmp.lt.f32.partialorder %v204_v29, 0.0004427343  ;;  %v211_v51 = vadd.f32 1.0, %v210_v30  ;;  %v203_v41 = vmul.f32 %v795_v53, %v202_v36 }
  0x41   :  { %v222_v55 = vand.u32 2147483647, %v808_v2  ;;  %vm873_vm5 = vcmp.lt.f32.partialorder %v213_v40, 0.0004427343  ;;  %v220_v47 = vadd.f32 1.0, %v219_v33  ;;  %v229_v63 = vadd.f32 1.0, %v228_v46 }
  0x42   :  { %v212_v3 = vmul.f32 %v803_v61, %v211_v51  ;;  %v231_v7 = vand.u32 2147483647, %v818_v5  ;;  %v730_v46 = vmov 1983009808  }
  0x43   :  { %vm891_vm6 = vcmp.lt.f32.partialorder %v222_v55, 0.0004427343  ;;  %v221_v61 = vmul.f32 %v808_v2, %v220_v47  ;;  %v230_v21 = vmul.f32 %v818_v5, %v229_v63  ;;  %v422_v55 = vshrl.u32 %v421_v45, 7 }
  0x44   :  { %v629_v37 = vpop.eup %628  ;;  %vm232_vm7 = vcmp.lt.f32.partialorder %v231_v7, 0.0004427343 }
  0x45   :  { %v631_v42 = vpop.eup %630  ;;  %v164_v43 = vmul.f32 0.6931472, %v629_v37  ;;  %vm425_vm8 = vcmp.lt.s32.totalorder %v422_v55, 2 }
  0x46   :  { %v633_v48 = vpop.eup %632  ;;  %v173_v34 = vmul.f32 0.6931472, %v631_v42 }
  0x47   :  { %v170_v52 = vsel %vm841_vm0, %v167_v31, %v164_v43  ;;  %v182_v54 = vmul.f32 0.6931472, %v633_v48  ;;  %v635_v56 = vpop.eup %634  ;;  %v439_v48 = vunpack.c.l.s4 %v730_v46 }
  0x48   :  { %v179_v57 = vsel %vm845_vm1, %v176_v38, %v173_v34  ;;  %v877_v59 = vadd.f32 %v170_v52, %v122_v1  ;;  %v191_v62 = vmul.f32 0.6931472, %v635_v56  ;;  %v637_v53 = vpop.eup %636 }
  0x49   :  { %v188_v60 = vsel %vm850_vm2, %v185_v44, %v182_v54  ;;  %v881_v0 = vadd.f32 %v179_v57, %v123_v9  ;;  %v200_v13 = vmul.f32 0.6931472, %v637_v53  ;;  %v639_v15 = vpop.eup %638  ;;  %v440_v56 = vunpack.c.0.s8 %v439_v48 }
  0x4a   :  { %v886_v4 = vadd.f32 %v188_v60, %v813_v10  ;;  %v242_v12 = vsub.f32 0.0, %v877_v59  ;;  %v197_v1 = vsel %vm857_vm3, %v194_v49, %v191_v62  ;;  %v641_v18 = vpop.eup %640  ;;  %v209_v20 = vmul.f32 0.6931472, %v639_v15 }
  0x4b   :  { %v243_v9 = vsub.f32 0.0, %v881_v0  ;;  %v898_v16 = vadd.f32 %v197_v1, %v815_v11  ;;  %v206_v19 = vsel %vm863_vm4, %v203_v41, %v200_v13  ;;  %v218_v23 = vmul.f32 0.6931472, %v641_v18  ;;  %v643_v11 = vpop.eup %642 }
  0x4c   :  { %v244_v10 = vsub.f32 0.0, %v886_v4  ;;  %v250_v17 = vmul.f32 1.442695, %v242_v12  ;;  %v905_v26 = vadd.f32 %v206_v19, %v820_v6  ;;  %v215_v27 = vsel %vm873_vm5, %v212_v3, %v209_v20 }
  0x4d   :  { %v252_v22 = vmul.f32 1.442695, %v243_v9  ;;  %v245_v2 = vsub.f32 0.0, %v898_v16  ;;  %v224_v29 = vsel %vm891_vm6, %v221_v61, %v218_v23  ;;  %v227_v30 = vmul.f32 0.6931472, %v643_v11 }
  0x4e   :  { %644 = vpow2.f32 %v250_v17  ;;  %v254_v28 = vmul.f32 1.442695, %v244_v10  ;;  %v239_v5 = vadd.f32 %v215_v27, %v824_v14  ;;  %v246_v31 = vsub.f32 0.0, %v905_v26 }
  0x4f   :  { %646 = vpow2.f32 %v252_v22  ;;  %v240_v6 = vadd.f32 %v224_v29, %v833_v24  ;;  %v256_v32 = vmul.f32 1.442695, %v245_v2  ;;  %v233_v35 = vsel %vm232_vm7, %v230_v21, %v227_v30 }
  0x50   :  { %648 = vpow2.f32 %v254_v28  ;;  %v247_v36 = vsub.f32 0.0, %v239_v5  ;;  %v258_v37 = vmul.f32 1.442695, %v246_v31  ;;  %v241_v38 = vadd.f32 %v233_v35, %v835_v25 }
  0x51   :  { %v248_v39 = vsub.f32 0.0, %v240_v6  ;;  %650 = vpow2.f32 %v256_v32  ;;  %v443_v1 = vsub.s32 %v440_v56, %v422_v55 }
  0x52   :  { %652 = vpow2.f32 %v258_v37  ;;  %v260_v40 = vmul.f32 1.442695, %v247_v36  ;;  %v249_v33 = vsub.f32 0.0, %v241_v38 }
  0x53   :  { %v262_v42 = vmul.f32 1.442695, %v248_v39 }
  0x54   :  { %654 = vpow2.f32 %v260_v40  ;;  %v264_v14 = vmul.f32 1.442695, %v249_v33 }
  0x55   :  { %656 = vpow2.f32 %v262_v42 }
  0x56   :  { %658 = vpow2.f32 %v264_v14 }
  0x5b   :  { %v645_v43 = vpop.eup %644 }
  0x5c   :  { %v647_v44 = vpop.eup %646  ;;  %v266_v24 = vsub.f32 1.0, %v645_v43 }
  0x5d   :  { %v649_v34 = vpop.eup %648  ;;  %v267_v49 = vsub.f32 1.0, %v647_v44 }
  0x5e   :  { %v274_v50 = vmul.f32 %v266_v24, %v266_v24  ;;  %v268_v25 = vsub.f32 1.0, %v649_v34  ;;  %v651_v51 = vpop.eup %650 }
  0x5f   :  { %v653_v52 = vpop.eup %652  ;;  %v269_v54 = vsub.f32 1.0, %v651_v51  ;;  %v275_v58 = vmul.f32 %v267_v49, %v267_v49 }
  0x60   :  { %v276_v41 = vmul.f32 %v268_v25, %v268_v25  ;;  %v270_v57 = vsub.f32 1.0, %v653_v52  ;;  %v282_v47 = vmul.f32 %v274_v50, %v877_v59 }
  0x61   :  { %v655_v60 = vpop.eup %654  ;;  %v277_v62 = vmul.f32 %v269_v54, %v269_v54  ;;  %v283_v9 = vmul.f32 %v275_v58, %v881_v0 }
  0x62   :  { %v284_v63 = vmul.f32 %v276_v41, %v886_v4  ;;  %v657_v53 = vpop.eup %656  ;;  %v271_v3 = vsub.f32 1.0, %v655_v60  ;;  %v278_v7 = vmul.f32 %v270_v57, %v270_v57 }
  0x63   :  { %v272_v12 = vsub.f32 1.0, %v657_v53  ;;  %v659_v13 = vpop.eup %658  ;;  %v285_v15 = vmul.f32 %v277_v62, %v898_v16 }
  0x64   :  { %v279_v8 = vmul.f32 %v271_v3, %v271_v3  ;;  %v434_v61 = vcombine.low %v282_v47, %v284_v63  ;;  %v273_v10 = vsub.f32 1.0, %v659_v13  ;;  %v286_v59 = vmul.f32 %v278_v7, %v905_v26 }
  0x65   :  { %v280_v17 = vmul.f32 %v272_v12, %v272_v12  ;;  %v435_v18 = vcombine.high %v282_v47, %v284_v63  ;;  %v470_v22 = vcombine.low %v283_v9, %v285_v15  ;;  %v471_v16 = vcombine.high %v283_v9, %v285_v15 }
  0x66   :  { %v281_v19 = vmul.f32 %v273_v10, %v273_v10  ;;  %v287_v20 = vmul.f32 %v279_v8, %v239_v5  ;;  %v444_v21 = vrot.slane %v434_v61, %v443_v1 }
  0x67   :  { %v288_v4 = vmul.f32 %v280_v17, %v240_v6  ;;  %v451_v27 = vrot.slane %v435_v18, %v443_v1  ;;  %v480_v31 = vrot.slane %v470_v22, %v443_v1 }
  0x68   :  { %v289_v23 = vmul.f32 %v281_v19, %v241_v38  ;;  %v487_v38 = vrot.slane %v471_v16, %v443_v1 }
  0x69   :  { %v436_v2 = vcombine.low %v286_v59, %v288_v4  ;;  %v437_v11 = vcombine.high %v286_v59, %v288_v4 }
  0x6a   :  { %v472_v0 = vcombine.low %v287_v20, %v289_v23  ;;  %v473_v30 = vcombine.high %v287_v20, %v289_v23 }
  0x6b   :  { %v458_v28 = vrot.slane %v436_v2, %v443_v1  ;;  %v465_v29 = vrot.slane %v437_v11, %v443_v1 }
  0x6c   :  { %v494_v37 = vrot.slane %v472_v0, %v443_v1  ;;  %v501_v39 = vrot.slane %v473_v30, %v443_v1 }
  0x6d   :  { %v466_v32 = vcombine.low %v444_v21, %v458_v28  ;;  %v467_v35 = vcombine.high %v444_v21, %v458_v28  ;;  %v468_v26 = vcombine.low %v451_v27, %v465_v29  ;;  %v469_v36 = vcombine.high %v451_v27, %v465_v29 }
  0x6e   :  { %v502_v40 = vcombine.low %v480_v31, %v494_v37  ;;  %v503_v14 = vcombine.high %v480_v31, %v494_v37  ;;  %v504_v24 = vcombine.low %v487_v38, %v501_v39  ;;  %v505_v48 = vcombine.high %v487_v38, %v501_v39 }
  0x6f   :  { %v514_v5 = vsel %vm425_vm8, %v466_v32, 0.0  ;;  %v515_v6 = vsel %vm425_vm8, %v467_v35, 0.0  ;;  %v516_v33 = vsel %vm425_vm8, %v468_v26, 0.0  ;;  %v517_v43 = vsel %vm425_vm8, %v469_v36, 0.0 }
  0x70   :  { %v565_v42 = vadd.f32 %v515_v6, %v514_v5  ;;  %v518_v45 = vsel %vm425_vm8, %v502_v40, 0.0  ;;  %v519_v34 = vsel %vm425_vm8, %v503_v14, 0.0  ;;  %v520_v50 = vsel %vm425_vm8, %v504_v24, 0.0 }
  0x71   :  { %v521_v51 = vsel %vm425_vm8, %v505_v48, 0.0 }
  0x72   :  { %v566_v44 = vadd.f32 %v565_v42, %v516_v33 }
  0x74   :  { %v567_v46 = vadd.f32 %v566_v44, %v517_v43 }
  0x76   :  { %v568_v49 = vadd.f32 %v567_v46, %v518_v45 }
  0x78   :  { %v569_v25 = vadd.f32 %v568_v49, %v519_v34 }
  0x7a   :  { %v570_v52 = vadd.f32 %v569_v25, %v520_v50 }
  0x7c   :  { %v571_v54 = vadd.f32 %v570_v52, %v521_v51 }
  0x7e   :  { %572 = vadd.xlane.f32.xlu0 %v571_v54 }
 0x107   :  { %v573_v41 = vpop.xlane.xlu0 %572 }
 0x108   :  { %v574_v56 = vrot.slane %v573_v41, 4 }
 0x10a   :  { %v575_v57 = vadd.f32 %v574_v56, %v573_v41 }
 0x10c   :  { %v576_v58 = vrot.slane %v575_v57, 2 }
 0x10e   :  { %v577_v47 = vadd.f32 %v576_v58, %v575_v57 }
 0x110   :  { %v578_v60 = vrot.slane %v577_v47, 1 }
 0x112   :  { %v579_v62 = vadd.f32 %v578_v60, %v577_v47 }
 0x114   :  { %604 = vpush %v579_v62 }
 0x145   :  { %s605_s23 = spop %604 }
 0x146   :  { %s581_s24 = smul.f32 0.00048828125, %s605_s23 }
 0x148   :  { %v582_v63 = vstv %s581_s24 }
 0x149   :  { %583 = vst [vmem:[#allocation8] sm:$0xff] %v582_v63 }
 0x14a   :  { %711 = shalt.err (!%p708_p0)
}
 0x14b   :  { %593 = dma.vmem_to_hbm [thread:$0]  %s591_s1, 128, %s934_s2, [#allocation5]  }
 0x14c   :  { %724 = dma.done.wait [#allocation5], 128  }
 0x14d   :  { %725 = vsyncadd [#allocation5], 4294967168 }
 0x14e   :  { %597 = vsyncpa [#allocation4], 1 }
 0x14f   :  { %598 = vsyncpa [#allocation7], 1 }
 0x150   :  { %599 = vsyncpa [#allocation5], 1 }

</bundles_post_ra>
